<compile_context>
chip_gen: v6e
topology: v6e:2x2x1
jax: 0.10.0
libtpu: 0.0.40
codegen_flags: <defaults>
</compile_context>

<pallas_src>
import functools

import jax
import jax.numpy as jnp
from jax.experimental import pallas as pl
from jax.experimental.pallas import tpu as pltpu

LANE = 128
# Explicit scoped-VMEM limit: raises v5e's 16 MiB default, matches v6e/v7x
# defaults, and stays well inside v7x's 64 MiB physical VMEM.
VMEM_LIMIT = 32 * 1024 * 1024


# ----------------------------------------------------------------------------
# Small helpers (padding / tile selection)
# ----------------------------------------------------------------------------
def _round_up(x, m):
    return (x + m - 1) // m * m


def _row_tiles(total, max_tile=512, align=16):
    """Pick a row (sublane) tile and the padded row count it divides."""
    tp = _round_up(total, align)
    if tp <= max_tile:
        return tp, tp
    for t in range(max_tile, align * 8 - 1, -align):
        if tp % t == 0:
            return t, tp
    return max_tile, _round_up(total, max_tile)


def _pad_last(a, size):
    d = size - a.shape[-1]
    if d:
        a = jnp.pad(a, [(0, 0)] * (a.ndim - 1) + [(0, d)])
    return a


def _pad_rows(a, rows):
    d = rows - a.shape[-2]
    if d:
        a = jnp.pad(a, [(0, 0)] * (a.ndim - 2) + [(0, d), (0, 0)])
    return a


# ----------------------------------------------------------------------------
# Kernel 1: tiled matmul + folded BN (+ optional ReLU) epilogue
# ----------------------------------------------------------------------------
def _matmul_bn_kernel(x_ref, w_ref, scale_ref, bias_ref, o_ref, acc_ref, *, relu):
    k = pl.program_id(2)

    @pl.when(k == 0)
    def _():
        acc_ref[...] = jnp.zeros_like(acc_ref)

    acc_ref[...] += jnp.dot(x_ref[...], w_ref[...],
                            preferred_element_type=jnp.float32)

    @pl.when(k == pl.num_programs(2) - 1)
    def _():
        y = acc_ref[...] * scale_ref[...] + bias_ref[...]
        if relu:
            y = jnp.maximum(y, 0.0)
        o_ref[...] = y.astype(o_ref.dtype)


def matmul_bn(x2d, w2d, scale, bias, *, relu=False, out_dtype=jnp.bfloat16,
              tm_max=512, tn_max=256, tk_max=256):
    """(M,K)@(K,N) with per-output-channel scale/bias epilogue (folded BN)."""
    M, K = x2d.shape
    K2, N = w2d.shape
    assert K == K2 and K % LANE == 0 and N % LANE == 0
    tm, Mp = _row_tiles(M, tm_max)
    if Mp != M:
        x2d = _pad_rows(x2d, Mp)
    tk = tk_max if K % tk_max == 0 else LANE
    tn = tn_max if N % tn_max == 0 else LANE
    gm, gn, gk = Mp // tm, N // tn, K // tk

    bytes_acc = int(Mp * K * x2d.dtype.itemsize + K * N * w2d.dtype.itemsize
                    + Mp * N * jnp.dtype(out_dtype).itemsize)
    cost = pl.CostEstimate(flops=int(2 * Mp * N * K), transcendentals=0,
                           bytes_accessed=bytes_acc)

    out = pl.pallas_call(
        functools.partial(_matmul_bn_kernel, relu=relu),
        out_shape=jax.ShapeDtypeStruct((Mp, N), out_dtype),
        grid=(gm, gn, gk),
        in_specs=[
            pl.BlockSpec((tm, tk), lambda i, j, k: (i, k)),
            pl.BlockSpec((tk, tn), lambda i, j, k: (k, j)),
            pl.BlockSpec((1, tn), lambda i, j, k: (0, j)),
            pl.BlockSpec((1, tn), lambda i, j, k: (0, j)),
        ],
        out_specs=pl.BlockSpec((tm, tn), lambda i, j, k: (i, j)),
        scratch_shapes=[pltpu.VMEM((tm, tn), jnp.float32)],
        compiler_params=pltpu.CompilerParams(
            dimension_semantics=("parallel", "parallel", "arbitrary"),
            vmem_limit_bytes=VMEM_LIMIT),
        cost_estimate=cost,
    )(x2d, w2d, scale, bias)
    return out[:M] if Mp != M else out


# ----------------------------------------------------------------------------
# Kernel 2: fused 3x3 conv (stride 1) + BN + ReLU.
# Per-sample: padded activation stays in VMEM; the 9 taps are 9 accumulating
# MXU matmuls into a f32 scratch (no im2col slab in HBM).
# ----------------------------------------------------------------------------
def _conv3x3_bn_relu_kernel(x_ref, w_ref, scale_ref, bias_ref, o_ref, acc_ref,
                            *, h_out, w_out):
    acc_ref[...] = jnp.zeros_like(acc_ref)
    for t in range(9):
        kh, kw = t // 3, t % 3
        xt = x_ref[pl.ds(kh, h_out), pl.ds(kw, w_out), :]
        xt = xt.reshape(h_out * w_out, xt.shape[-1])
        acc_ref[...] += jnp.dot(xt, w_ref[t],
                                preferred_element_type=jnp.float32)
    y = acc_ref[...] * scale_ref[...] + bias_ref[...]
    o_ref[...] = jnp.maximum(y, 0.0).astype(o_ref.dtype)


def conv3x3_bn_relu(x_pad, w_taps, scale, bias):
    """x_pad: (N, H+2, W+2, Cp) bf16; returns (N, H*W, Cout) bf16."""
    N, Hp, Wp, Cp = x_pad.shape
    h_out, w_out = Hp - 2, Wp - 2
    hw = h_out * w_out
    Cout = w_taps.shape[-1]
    cost = pl.CostEstimate(
        flops=int(2 * 9 * N * hw * Cp * Cout), transcendentals=0,
        bytes_accessed=int(x_pad.size * 2 + w_taps.size * 2 + N * hw * Cout * 2))
    return pl.pallas_call(
        functools.partial(_conv3x3_bn_relu_kernel, h_out=h_out, w_out=w_out),
        out_shape=jax.ShapeDtypeStruct((N, hw, Cout), jnp.bfloat16),
        grid=(N,),
        in_specs=[
            pl.BlockSpec((None, Hp, Wp, Cp), lambda n: (n, 0, 0, 0)),
            pl.BlockSpec((9, Cp, Cout), lambda n: (0, 0, 0)),
            pl.BlockSpec((1, Cout), lambda n: (0, 0)),
            pl.BlockSpec((1, Cout), lambda n: (0, 0)),
        ],
        out_specs=pl.BlockSpec((None, hw, Cout), lambda n: (n, 0, 0)),
        scratch_shapes=[pltpu.VMEM((hw, Cout), jnp.float32)],
        compiler_params=pltpu.CompilerParams(
            dimension_semantics=("parallel",),
            vmem_limit_bytes=VMEM_LIMIT),
        cost_estimate=cost,
    )(x_pad, w_taps, scale, bias)


# ----------------------------------------------------------------------------
# Kernel 3: fused conv3 (1x1) + BN, shortcut (1x1 conv+BN or identity),
# residual add, pre-ReLU global-average-pool feature map, final ReLU.
# Grid: (sample [parallel], hw row tile [arbitrary]); fmap accumulated in a
# resident output block and normalized at the last hw step.
# ----------------------------------------------------------------------------
def _fuse_epilogue(s, out_ref, fmap_ref, hw_true):
    hw_i = pl.program_id(1)
    thw = s.shape[0]
    rows = hw_i * thw + jax.lax.broadcasted_iota(jnp.int32, (thw, 1), 0)
    s_valid = jnp.where(rows < hw_true, s, 0.0)          # mask padded rows
    # fmap block is (8, C) with 8 identical rows (keeps the block 8x128-tiled).
    fmap_ref[...] += jnp.sum(s_valid, axis=0, keepdims=True)
    out_ref[...] = jnp.maximum(s, 0.0).astype(out_ref.dtype)

    @pl.when(hw_i == pl.num_programs(1) - 1)
    def _():
        fmap_ref[...] *= (1.0 / hw_true)


def _conv3_residual_kernel_conv_sc(y2_ref, w3_ref, s3_ref, b3_ref,
                                   xs_ref, ws_ref, ss_ref, bs_ref,
                                   out_ref, fmap_ref, *, hw_true):
    @pl.when(pl.program_id(1) == 0)
    def _():
        fmap_ref[...] = jnp.zeros_like(fmap_ref)
    y = jnp.dot(y2_ref[...], w3_ref[...], preferred_element_type=jnp.float32)
    y = y * s3_ref[...] + b3_ref[...]
    sc = jnp.dot(xs_ref[...], ws_ref[...], preferred_element_type=jnp.float32)
    sc = sc * ss_ref[...] + bs_ref[...]
    _fuse_epilogue(y + sc, out_ref, fmap_ref, hw_true)


def _conv3_residual_kernel_id_sc(y2_ref, w3_ref, s3_ref, b3_ref, xs_ref,
                                 out_ref, fmap_ref, *, hw_true):
    @pl.when(pl.program_id(1) == 0)
    def _():
        fmap_ref[...] = jnp.zeros_like(fmap_ref)
    y = jnp.dot(y2_ref[...], w3_ref[...], preferred_element_type=jnp.float32)
    y = y * s3_ref[...] + b3_ref[...]
    sc = xs_ref[...].astype(jnp.float32)
    _fuse_epilogue(y + sc, out_ref, fmap_ref, hw_true)


def conv3_residual_pool_relu(y2, w3, s3, b3, xs, ws=None, ss=None, bs=None,
                             *, thw_max=512):
    N, HW, Kp = y2.shape
    C4p = w3.shape[1]
    Cinp = xs.shape[-1]
    thw, HWp = _row_tiles(HW, thw_max)
    if HWp != HW:
        y2 = _pad_rows(y2, HWp)
        xs = _pad_rows(xs, HWp)
    grid = (N, HWp // thw)

    vec_spec = pl.BlockSpec((1, C4p), lambda n, h: (0, 0))
    in_specs = [
        pl.BlockSpec((None, thw, Kp), lambda n, h: (n, h, 0)),   # y2 tile
        pl.BlockSpec((Kp, C4p), lambda n, h: (0, 0)),            # w3 (resident)
        vec_spec, vec_spec,                                      # scale3 / bias3
        pl.BlockSpec((None, thw, Cinp), lambda n, h: (n, h, 0)), # shortcut input
    ]
    args = [y2, w3, s3, b3, xs]
    flops = 2 * N * HWp * Kp * C4p
    if ws is not None:
        kernel = functools.partial(_conv3_residual_kernel_conv_sc, hw_true=HW)
        in_specs += [pl.BlockSpec((Cinp, C4p), lambda n, h: (0, 0)),
                     vec_spec, vec_spec]
        args += [ws, ss, bs]
        flops += 2 * N * HWp * Cinp * C4p
    else:
        kernel = functools.partial(_conv3_residual_kernel_id_sc, hw_true=HW)

    cost = pl.CostEstimate(
        flops=int(flops), transcendentals=0,
        bytes_accessed=int(y2.size * 2 + xs.size * 2 + w3.size * 2
                           + N * HWp * C4p * 4 + N * 8 * C4p * 4))

    out, fmap = pl.pallas_call(
        kernel,
        out_shape=(jax.ShapeDtypeStruct((N, HWp, C4p), jnp.float32),
                   jax.ShapeDtypeStruct((N, 8, C4p), jnp.float32)),
        grid=grid,
        in_specs=in_specs,
        out_specs=(pl.BlockSpec((None, thw, C4p), lambda n, h: (n, h, 0)),
                   pl.BlockSpec((None, 8, C4p), lambda n, h: (n, 0, 0))),
        compiler_params=pltpu.CompilerParams(
            dimension_semantics=("parallel", "arbitrary"),
            vmem_limit_bytes=VMEM_LIMIT),
        cost_estimate=cost,
    )(*args)
    return out[:, :HW, :], fmap[:, 0, :]


# ----------------------------------------------------------------------------
# Parameter init / preparation (weight re-layout + BN folding hoisted here)
# ----------------------------------------------------------------------------
def _fold_bn(gamma, beta, mean, var, eps=1e-5):
    scale = gamma / jnp.sqrt(var + eps)
    bias = beta - mean * scale
    return scale, bias


def _fold_bn_padded(bn, cp):
    scale, bias = _fold_bn(*bn)
    return (_pad_last(scale.reshape(1, -1), cp).astype(jnp.float32),
            _pad_last(bias.reshape(1, -1), cp).astype(jnp.float32))


def init_params(key, in_planes, planes, stride):
    c4 = 4 * planes
    ks = jax.random.split(key, 8)

    def conv_w(k, cout, cin, kh, kw):
        fan_in = cin * kh * kw
        return jax.random.normal(k, (cout, cin, kh, kw), jnp.float32) * jnp.sqrt(2.0 / fan_in)

    def bn_stats(k, c):
        k1, k2, k3, k4 = jax.random.split(k, 4)
        gamma = 1.0 + 0.1 * jax.random.normal(k1, (c,), jnp.float32)
        beta = 0.1 * jax.random.normal(k2, (c,), jnp.float32)
        mean = 0.1 * jax.random.normal(k3, (c,), jnp.float32)
        var = jnp.abs(jax.random.normal(k4, (c,), jnp.float32)) + 0.5
        return (gamma, beta, mean, var)

    p = {"stride": stride}
    p["w1"] = conv_w(ks[0], planes, in_planes, 1, 1)
    p["bn1"] = bn_stats(ks[1], planes)
    p["w2"] = conv_w(ks[2], planes, planes, 3, 3)
    p["bn2"] = bn_stats(ks[3], planes)
    p["w3"] = conv_w(ks[4], c4, planes, 1, 1)
    p["bn3"] = bn_stats(ks[5], c4)
    if stride != 1 or in_planes != c4:
        p["ws"] = conv_w(ks[6], c4, in_planes, 1, 1)
        p["bns"] = bn_stats(ks[7], c4)
    else:
        p["ws"] = None
    return p


def prepare_params(p):
    """One-time: OIHW -> matmul-ready bf16 matrices, zero-pad channels to
    multiples of 128, fold BN into per-channel scale/bias."""
    planes, in_planes = p["w1"].shape[0], p["w1"].shape[1]
    c4 = 4 * planes
    Cinp = _round_up(in_planes, LANE)
    Pp = _round_up(planes, LANE)
    C4p = _round_up(c4, LANE)

    def mat1x1(w, kin, kout):
        m = w[:, :, 0, 0].T                    # (Cin, Cout)
        m = jnp.pad(m, ((0, kin - m.shape[0]), (0, kout - m.shape[1])))
        return m.astype(jnp.bfloat16)

    q = {"stride": p["stride"], "planes": planes,
         "Cinp": Cinp, "Pp": Pp, "C4p": C4p,
         "has_sc_conv": p["ws"] is not None}
    q["w1m"] = mat1x1(p["w1"], Cinp, Pp)
    q["w3m"] = mat1x1(p["w3"], Pp, C4p)
    taps = jnp.transpose(p["w2"], (2, 3, 1, 0)).reshape(9, planes, planes)
    taps = jnp.pad(taps, ((0, 0), (0, Pp - planes), (0, Pp - planes)))
    q["w2t"] = taps.astype(jnp.bfloat16)        # (9, Pp, Pp) per-tap matrices
    q["w2m"] = q["w2t"].reshape(9 * Pp, Pp)     # im2col-ordered (stride>1 fallback)
    q["s1"], q["b1"] = _fold_bn_padded(p["bn1"], Pp)
    q["s2"], q["b2"] = _fold_bn_padded(p["bn2"], Pp)
    q["s3"], q["b3"] = _fold_bn_padded(p["bn3"], C4p)
    if p["ws"] is not None:
        q["wsm"] = mat1x1(p["ws"], Cinp, C4p)
        q["ss"], q["bs"] = _fold_bn_padded(p["bns"], C4p)
    return q


def im2col_3x3(x_nhwc, stride):
    N, H, W, C = x_nhwc.shape
    xp = jnp.pad(x_nhwc, ((0, 0), (1, 1), (1, 1), (0, 0)))
    Ho = (H + 2 - 3) // stride + 1
    Wo = (W + 2 - 3) // stride + 1
    cols = []
    for kh in range(3):
        for kw in range(3):
            cols.append(xp[:, kh:kh + (Ho - 1) * stride + 1:stride,
                              kw:kw + (Wo - 1) * stride + 1:stride, :])
    patches = jnp.concatenate(cols, axis=-1)
    return patches.reshape(N * Ho * Wo, 9 * C), Ho, Wo


# ----------------------------------------------------------------------------
# Forward pass
# ----------------------------------------------------------------------------
def bottleneck_forward(x_nchw, q):
    """Returns (out_nchw, feature_map) — feature_map is the module attribute."""
    stride = q["stride"]
    planes = q["planes"]
    c4 = 4 * planes
    Cinp, Pp = q["Cinp"], q["Pp"]

    N, _, H, W = x_nchw.shape
    x = jnp.transpose(x_nchw, (0, 2, 3, 1)).astype(jnp.float32)     # NHWC
    xb = _pad_last(x, Cinp).astype(jnp.bfloat16)                    # lane-dense bf16

    # conv1: 1x1 + BN + ReLU (tiled MXU matmul)
    y1 = matmul_bn(xb.reshape(-1, Cinp), q["w1m"], q["s1"], q["b1"],
                   relu=True, out_dtype=jnp.bfloat16)
    y1 = y1.reshape(N, H, W, Pp)

    # conv2: 3x3 (stride) + BN + ReLU
    if stride == 1:
        y1p = jnp.pad(y1, ((0, 0), (1, 1), (1, 1), (0, 0)))
        y2 = conv3x3_bn_relu(y1p, q["w2t"], q["s2"], q["b2"])       # (N, H*W, Pp)
        Ho, Wo = H, W
    else:
        # TODO(synk): stride>1 falls back to im2col + tiled matmul; a fully
        # fused strided-tap kernel would need strided VMEM tap slices.
        patches, Ho, Wo = im2col_3x3(y1, stride)
        y2 = matmul_bn(patches, q["w2m"], q["s2"], q["b2"],
                       relu=True, out_dtype=jnp.bfloat16)
        y2 = y2.reshape(N, Ho * Wo, Pp)
    HW2 = Ho * Wo

    # conv3 + shortcut + residual + pre-ReLU global avg pool + ReLU (fused)
    if q["has_sc_conv"]:
        xs = xb[:, ::stride, ::stride, :].reshape(N, HW2, Cinp)
        out, fmap = conv3_residual_pool_relu(
            y2, q["w3m"], q["s3"], q["b3"], xs, q["wsm"], q["ss"], q["bs"])
    else:
        xs = xb.reshape(N, HW2, Cinp)       # identity: Cinp == C4p, stride == 1
        out, fmap = conv3_residual_pool_relu(y2, q["w3m"], q["s3"], q["b3"], xs)

    out = out[:, :, :c4].reshape(N, Ho, Wo, c4)
    out_nchw = jnp.transpose(out, (0, 3, 1, 2))
    fmap = jnp.squeeze(fmap[:, :c4])        # mirror torch .squeeze()
    return out_nchw, fmap


# ----------------------------------------------------------------------------
# Pure-JAX reference (correctness check only)
# ----------------------------------------------------------------------------
def _conv_bn_ref(x_nhwc, w_oihw, bn, stride=1, padding=0, relu=False):
    scale, bias = _fold_bn(*bn)
    w_hwio = jnp.transpose(w_oihw, (2, 3, 1, 0))
    y = jax.lax.conv_general_dilated(
        x_nhwc, w_hwio, (stride, stride),
        [(padding, padding), (padding, padding)],
        dimension_numbers=("NHWC", "HWIO", "NHWC"))
    y = y * scale.reshape(1, 1, 1, -1) + bias.reshape(1, 1, 1, -1)
    return jnp.maximum(y, 0.0) if relu else y


def bottleneck_ref(x_nchw, p):
    stride = p["stride"]
    x = jnp.transpose(x_nchw, (0, 2, 3, 1)).astype(jnp.float32)
    out = _conv_bn_ref(x, p["w1"], p["bn1"], relu=True)
    out = _conv_bn_ref(out, p["w2"], p["bn2"], stride=stride, padding=1, relu=True)
    out = _conv_bn_ref(out, p["w3"], p["bn3"])
    sc = _conv_bn_ref(x, p["ws"], p["bns"], stride=stride) if p["ws"] is not None else x
    out = out + sc
    fmap = jnp.squeeze(jnp.mean(out, axis=(1, 2)))
    out = jnp.maximum(out, 0.0)
    return jnp.transpose(out, (0, 3, 1, 2)), fmap


# ----------------------------------------------------------------------------
if __name__ == "__main__":
    key = jax.random.PRNGKey(0)
    configs = [
        # (in_planes, planes, stride, H, W, batch)
        (4, 4, 1, 32, 32, 2),    # conv shortcut, stride 1: fully fused path
        (16, 4, 1, 16, 16, 2),   # identity shortcut
        (4, 4, 2, 16, 16, 2),    # stride 2 (conv2 im2col fallback, K-accum grid)
    ]
    for cfg_i, (cin, planes, stride, H, W, B) in enumerate(configs):
        kx, kp, key = jax.random.split(key, 3)
        x = jax.random.normal(kx, (B, cin, H, W), jnp.float32)     # NCHW
        raw = init_params(kp, cin, planes, stride)
        prep = prepare_params(raw)

        out, fmap = bottleneck_forward(x, prep)
        out = jax.block_until_ready(out)
        fmap = jax.block_until_ready(fmap)

        out_ref, fmap_ref = bottleneck_ref(x, raw)
        assert out.shape == out_ref.shape, (cfg_i, out.shape, out_ref.shape)
        assert fmap.shape == fmap_ref.shape, (cfg_i, fmap.shape, fmap_ref.shape)
        # bf16 operands -> loose tolerance; structural bugs give O(1)+ errors.
        assert jnp.allclose(out, out_ref, rtol=1e-1, atol=1.5e-1), f"out mismatch cfg {cfg_i}"
        assert jnp.allclose(fmap, fmap_ref, rtol=1e-1, atol=1.5e-1), f"fmap mismatch cfg {cfg_i}"

    print("KERNEL_OK")
</pallas_src>

<mosaic_0001>
module attributes {stable_mosaic.version = 11 : i64} {
  func.func @_matmul_bn_kernel(%arg0: i32, %arg1: i32, %arg2: i32, %arg3: memref<512x128xbf16, #tpu.memory_space<vmem>>, %arg4: memref<128x128xbf16, #tpu.memory_space<vmem>>, %arg5: memref<1x128xf32, #tpu.memory_space<vmem>>, %arg6: memref<1x128xf32, #tpu.memory_space<vmem>>, %arg7: memref<512x128xbf16, #tpu.memory_space<vmem>>, %arg8: memref<512x128xf32, #tpu.memory_space<vmem>>) attributes {dimension_semantics = [#tpu.dimension_semantics<parallel>, #tpu.dimension_semantics<parallel>, #tpu.dimension_semantics<arbitrary>], iteration_bounds = array<i64: 4, 1, 1>, scalar_prefetch = 0 : i64, scratch_operands = 1 : i64, tpu.core_type = #tpu.core_type<tc>, window_params = [{transform_indices = @transform_0, window_bounds = array<i64: 512, 128>}, {transform_indices = @transform_1, window_bounds = array<i64: 128, 128>}, {transform_indices = @transform_2, window_bounds = array<i64: 1, 128>}, {transform_indices = @transform_3, window_bounds = array<i64: 1, 128>}, {transform_indices = @transform_4, window_bounds = array<i64: 512, 128>}]} {
    %c0_i32 = arith.constant 0 : i32
    %0 = arith.cmpi eq, %arg2, %c0_i32 : i32
    %1 = arith.extui %0 : i1 to i32
    %c0_i32_0 = arith.constant 0 : i32
    %2 = arith.cmpi ne, %1, %c0_i32_0 : i32
    scf.if %2 {
      %cst_10 = arith.constant 0.000000e+00 : f32
      %12 = vector.broadcast %cst_10 : f32 to vector<512x128xf32>
      %c0_11 = arith.constant 0 : index
      %c0_12 = arith.constant 0 : index
      %13 = vector.load %arg8[%c0_11, %c0_12] : memref<512x128xf32, #tpu.memory_space<vmem>>, vector<512x128xf32>
      tpu.vector_store %arg8[%c0_11, %c0_12], %12 {strides = array<i32>} : memref<512x128xf32, #tpu.memory_space<vmem>>, vector<512x128xf32>,
    } else {
    }
    %c0 = arith.constant 0 : index
    %c0_1 = arith.constant 0 : index
    %3 = vector.load %arg8[%c0, %c0_1] : memref<512x128xf32, #tpu.memory_space<vmem>>, vector<512x128xf32>
    %c0_2 = arith.constant 0 : index
    %c0_3 = arith.constant 0 : index
    %4 = vector.load %arg3[%c0_2, %c0_3] : memref<512x128xbf16, #tpu.memory_space<vmem>>, vector<512x128xbf16>
    %c0_4 = arith.constant 0 : index
    %c0_5 = arith.constant 0 : index
    %5 = vector.load %arg4[%c0_4, %c0_5] : memref<128x128xbf16, #tpu.memory_space<vmem>>, vector<128x128xbf16>
    %cst = arith.constant dense<0.000000e+00> : vector<512x128xf32>
    %6 = tpu.matmul %4, %5, %cst {dimension_numbers = #tpu.dot_dimension_numbers<[1], [0], [0], [1], [0, 0, 1, 1], [], []>} : vector<512x128xbf16>, vector<128x128xbf16>, vector<512x128xf32> -> vector<512x128xf32>
    %7 = arith.addf %3, %6 : vector<512x128xf32>
    %c0_6 = arith.constant 0 : index
    %c0_7 = arith.constant 0 : index
    %8 = vector.load %arg8[%c0_6, %c0_7] : memref<512x128xf32, #tpu.memory_space<vmem>>, vector<512x128xf32>
    tpu.vector_store %arg8[%c0_6, %c0_7], %7 {strides = array<i32>} : memref<512x128xf32, #tpu.memory_space<vmem>>, vector<512x128xf32>,
    %c0_i32_8 = arith.constant 0 : i32
    %9 = arith.cmpi eq, %arg2, %c0_i32_8 : i32
    %10 = arith.extui %9 : i1 to i32
    %c0_i32_9 = arith.constant 0 : i32
    %11 = arith.cmpi ne, %10, %c0_i32_9 : i32
    scf.if %11 {
      %c0_10 = arith.constant 0 : index
      %c0_11 = arith.constant 0 : index
      %12 = vector.load %arg8[%c0_10, %c0_11] : memref<512x128xf32, #tpu.memory_space<vmem>>, vector<512x128xf32>
      %c0_12 = arith.constant 0 : index
      %c0_13 = arith.constant 0 : index
      %13 = vector.load %arg5[%c0_12, %c0_13] : memref<1x128xf32, #tpu.memory_space<vmem>>, vector<1x128xf32>
      %14 = vector.broadcast %13 : vector<1x128xf32> to vector<512x128xf32>
      %15 = arith.mulf %12, %14 : vector<512x128xf32>
      %c0_14 = arith.constant 0 : index
      %c0_15 = arith.constant 0 : index
      %16 = vector.load %arg6[%c0_14, %c0_15] : memref<1x128xf32, #tpu.memory_space<vmem>>, vector<1x128xf32>
      %17 = vector.broadcast %16 : vector<1x128xf32> to vector<512x128xf32>
      %18 = arith.addf %15, %17 : vector<512x128xf32>
      %cst_16 = arith.constant 0.000000e+00 : f32
      %19 = vector.broadcast %cst_16 : f32 to vector<512x128xf32>
      %20 = arith.maximumf %18, %19 : vector<512x128xf32>
      %21 = arith.truncf %20 : vector<512x128xf32> to vector<512x128xbf16>
      %c0_17 = arith.constant 0 : index
      %c0_18 = arith.constant 0 : index
      %22 = vector.load %arg7[%c0_17, %c0_18] : memref<512x128xbf16, #tpu.memory_space<vmem>>, vector<512x128xbf16>
      tpu.vector_store %arg7[%c0_17, %c0_18], %21 {strides = array<i32>} : memref<512x128xbf16, #tpu.memory_space<vmem>>, vector<512x128xbf16>,
    } else {
    }
    return
  }
  func.func @transform_0(%arg0: i32, %arg1: i32, %arg2: i32) -> (i32, i32) {
    %c0_i32 = arith.constant 0 : i32
    return %arg0, %arg2 : i32, i32
  }
  func.func @transform_1(%arg0: i32, %arg1: i32, %arg2: i32) -> (i32, i32) {
    %c0_i32 = arith.constant 0 : i32
    return %arg2, %arg1 : i32, i32
  }
  func.func @transform_2(%arg0: i32, %arg1: i32, %arg2: i32) -> (i32, i32) {
    %c0_i32 = arith.constant 0 : i32
    %c0_i32_0 = arith.constant 0 : i32
    return %c0_i32, %arg1 : i32, i32
  }
  func.func @transform_3(%arg0: i32, %arg1: i32, %arg2: i32) -> (i32, i32) {
    %c0_i32 = arith.constant 0 : i32
    %c0_i32_0 = arith.constant 0 : i32
    return %c0_i32, %arg1 : i32, i32
  }
  func.func @transform_4(%arg0: i32, %arg1: i32, %arg2: i32) -> (i32, i32) {
    %c0_i32 = arith.constant 0 : i32
    return %arg0, %arg1 : i32, i32
  }
}

</mosaic_0001>

<bundles_post_ra>
// kernel: tpu_custom_call.1
= control target key start
LH: loop header
LB: loop body
LE: loop exit
PB: predicated region body
PF: predicated region fallthrough
CT: control target
= control target key end

     0   :  { %s3104_s0 = inlined_call_operand.hbm [shape: bf16[2048,128], index: 0, kind: input, shape index: {}]   ;;  %s3105_s1 = inlined_call_operand.hbm [shape: bf16[128,128], index: 1, kind: input, shape index: {}]   ;;  %s3106_s2 = inlined_call_operand.vmem [shape: f32[1,128], index: 2, kind: input, shape index: {}]   ;;  %s3107_s3 = inlined_call_operand.vmem [shape: f32[1,128], index: 3, kind: input, shape index: {}]   ;;  %s3108_s4 = inlined_call_operand.hbm [shape: bf16[2048,128], index: 4, kind: output, shape index: {}]  }
   0x1   :  { %3112 = sst [smem:[#allocation12_spill]] %s3105_s1 }
   0x2   :  { %9 = vsyncpa [#allocation4], 0 }
   0x3   :  { %11 = vsyncpa [#allocation4 + $0x1], 0 }
   0x4   :  { %12 = vsyncpa [#allocation7], 0 }
   0x5   :  { %13 = vsyncpa [#allocation5], 0 }
   0x6   :  { %15 = vsyncpa [#allocation5 + $0x1], 0  ;;  %s2708_s15 = smov 0   ;;  %s2710_s16 = smov 0  }
   0x7   :  { %s2712_s17 = smov 0   ;;  %s2714_s18 = smov 0  }
   0x8   :  { %s2716_s19 = smov 0   ;;  %s2718_s20 = smov 0  }
   0x9 LB: > { %s1901_s21 = sadd.s32 4294967295, %s2674_s20   ;;  %s1902_s22 = sadd.s32 4294967294, %s2674_s20   ;;  %s2674_s20 = sphi %s2718_s20, %s21_s20   ;;  %s2670_s19 = sphi %s2716_s19, %s3131_s19   ;;  %s2666_s18 = sphi %s2714_s18, %s3130_s18   ;;  %s2662_s17 = sphi %s2712_s17, %s3129_s17   ;;  %s2658_s16 = sphi %s2710_s16, %s3128_s16   ;;  %s2654_s15 = sphi %s2708_s15, %s3127_s15  }
   0xa   : > { %p62_p0 = scmp.ne.s32.totalorder %s2658_s16, %s2654_s15  ;;  %p2742_p1 = scmp.eq.s32.totalorder %s1901_s21, 0 }
   0xb   : > { %p2746_p2 = scmp.eq.s32.totalorder %s1901_s21, 3  ;;  %p174_p3 = scmp.eq.s32.totalorder %s1902_s22, 3 }
   0xc   : > { %p2752_p4 = por %p2742_p1, %p62_p0  ;;  %p1903_p5 = scmp.ge.s32.totalorder %s2674_s20, 1 }
   0xd   : > { %p2757_p6 = por %p174_p3, %p62_p0  ;;  %p181_p7 = scmp.lt.s32.totalorder %s2674_s20, 5 }
   0xe   : > { %s2676_s28 = smov [#allocation6]   ;;  %s40_s5 = sadd.s32 1, %s2670_s19 }
   0xf   : > { %s3116_s26 = scalar_select %p2757_p6, 1, 0 }
  0x10   : > { %p2762_p8 = pnand %p1903_p5, %p181_p7  ;;  %s197_s29 = sshll.u32 %s2676_s28, 4  ;;  %s198_s29 = int_to_ptr.vmem [resolvable:$true] %s197_s29 }
  0x11   : > { %s2547_s6 = scalar_lea.vmem %s198_s29, 1024  ;;  %p2555_p3 = scmp.lt.s32.totalorder %s198_s29, %s198_s29 }
  0x12   : > { %p2427_p9 = pneg %p2762_p8  ;;  %p2548_p12 = scmp.ne.s32.totalorder %s198_s29, %s2547_s6 }
  0x13   : > { %p2556_p5 = scmp.lt.s32.totalorder %s2547_s6, %s2547_s6 }
  0x14   : > { %p2770_p10 = pnand %p2427_p9, %p2742_p1 }
  0x15   : > { %p2557_p7 = por %p2556_p5, %p2555_p3 }
  0x16   : > { %p2538_p11 = pneg %p2770_p10 }
  0x18   : > { %p2550_p13 = pnand %p2548_p12, %p2538_p11 }
  0x1a   : > { %p2551_p0 = pneg %p2550_p13 }
  0x1c   : > { %p2558_p6 = pnand %p2557_p7, %p2551_p0 }
  0x1e   : > { %2561 = shalt.err (!%p2558_p6)
}
  0x1f   : > { %s3109_s7 = smov 64   ;;  %s3110_s8 = smov 4  }
  0x20   : > { %s3119_s1 = sld [smem:[#allocation12_spill]]  ;;  %p42_p6 = scmp.ge.s32.totalorder %s40_s5, 4 }
  0x21   : > { %s49_s11 = sadd.s32 1, %s2662_s17  ;;  %p56_p9 = scmp.ne.s32.totalorder %s2662_s17, %s2658_s16 }
  0x22   : > { %p57_p11 = scmp.eq.s32.totalorder %s2674_s20, 0  ;;  %s3133_s5 = smov (%p42_p6, %s40_s5), 0 }
  0x23   : > { %p2797_p13 = por %p2746_p2, %p56_p9  ;;  %s44_s14 = ssub.s32 %s2670_s19, %s3133_s5 }
  0x24   : > { %p2791_p12 = por %p57_p11, %p56_p9  ;;  %p2440_p0 = scmp.lt.s32.totalorder %s2674_s20, 4 }
  0x25   : > { %s3121_s13 = scalar_select %p2797_p13, 1, 0 }
  0x26   : > { %2430 = dma.hbm_to_vmem [thread:$0]  (!%p2770_p10), %s3119_s1, 1024, %s198_s29, [#allocation7], %s3109_s7, %s3109_s7, %s3110_s8  }
  0x27   : > { %p47_p10 = scmp.eq.s32.totalorder %s44_s14, 0  ;;  %s223_s21 = sand.u32 1, %s2662_s17  }
  0x28   : > { %s1908_s22 = sshll.u32 %s223_s21, 8  ;;  %s2026_s29 = sshll.u32 %s2670_s19, 12 }
  0x29   : > { %s2806_s28 = scalar_select %p47_p10, %s2662_s17, %s49_s11  }
  0x2a   : > { %s234_s9 = scalar_lea.hbm %s3104_s0, %s2026_s29  ;;  %s227_s10 = scalar_lea.vmem [#allocation3], %s1908_s22 }
  0x2b   : > { %s235_s7 = sshll.u32 %s227_s10, 4  ;;  %p2814_p2 = pnand %p2440_p0, %p2791_p12  ;;  %s236_s7 = int_to_ptr.vmem [resolvable:$true] %s235_s7 }
  0x2c   : > { %s224_s8 = scalar_lea.sflag [#allocation4], %s223_s21  ;;  %s2575_s14 = scalar_lea.vmem %s236_s7, 4096 }
  0x2d   : > { %p2564_p3 = pneg %p2814_p2  ;;  %p2576_p5 = scmp.ne.s32.totalorder %s236_s7, %s2575_s14 }
  0x2e   : > { %s2679_s11 = smov [#allocation3]  }
  0x2f   : > { %p2578_p7 = pnand %p2576_p5, %p2564_p3  ;;  %s2580_s1 = sshll.u32 %s2679_s11, 4  ;;  %s2581_s1 = int_to_ptr.vmem [resolvable:$false] %s2580_s1 }
  0x30   : > { %s2582_s29 = scalar_lea.vmem %s2581_s1, 8192  ;;  %p2583_p9 = scmp.lt.s32.totalorder %s236_s7, %s2581_s1 }
  0x31   : > { %p2579_p6 = pneg %p2578_p7  ;;  %p2584_p11 = scmp.lt.s32.totalorder %s2582_s29, %s2575_s14 }
  0x33   : > { %p2585_p10 = por %p2584_p11, %p2583_p9 }
  0x35   : > { %p2586_p13 = pnand %p2585_p10, %p2579_p6 }
  0x37   : > { %2589 = shalt.err (!%p2586_p13)
}
  0x38   : > { %s3123_s12 = smov 4   ;;  %s3124_s22 = smov 64  }
  0x39   : > { %2434 = dma.hbm_to_vmem [thread:$0]  (!%p2814_p2), %s234_s9, 4096, %s236_s7, %s224_s8, %s3124_s22, %s3124_s22, %s3123_s12  }
  0x3a   : > { %247 = sbr.rel (%p2762_p8) target bundleno = 376 (0x178), region = 36  ;;  %s2828_s21 = sand.u32 (!%p2762_p8), 1, %s2658_s16  }
  0x3b   : > { %s1912_s1 = sshll.u32 (!%p2762_p8), %s2828_s21, 8  ;;  %s250_s30 = scalar_lea.sflag (!%p2762_p8), [#allocation4], %s2828_s21 }
  0x3c   : > { %s2834_s6 = scalar_lea.vmem (!%p2762_p8), [#allocation3], %s1912_s1 }
  0x3f   : > { %2641 = dma.done.wait (%p2752_p4), %s250_s30, 4096  }
  0x40   : > { %2643 = vsyncadd (%p2752_p4), %s250_s30, 4294963200 }
  0x41   : > { %2645 = dma.done.wait (%p2742_p1), [#allocation7], 1024  }
  0x42   : > { %2647 = vsyncadd (%p2742_p1), [#allocation7], 4294966272  ;;  %v2496_v0 = vld [vmem:[#allocation6 + $0x38] sm:$0xff]   ;;  %v2497_v1 = vld [vmem:[#allocation6 + $0x30] sm:$0xff]   ;;  %s2908_s8 = scalar_lea.vmem [#allocation8], %s1912_s1  ;;  %s2091_s9 = sshll.u32 %s2666_s18, 12 }
  0x43   : > { %2323 = vmatprep.subr.bf16.mxu0 %v2496_v0  ;;  %2403 = vmatprep.subr.bf16.mxu1 %v2496_v0  ;;  %v2498_v2 = vld [vmem:[#allocation6 + $0x28] sm:$0xff]   ;;  %v2499_v3 = vld [vmem:[#allocation6 + $0x20] sm:$0xff]   ;;  %v2500_v6 = vld [vmem:[#allocation6 + $0x18] sm:$0xff]   ;;  %s1775_s10 = sshll.u32 %s2908_s8, 4  ;;  %s3051_s18 = scalar_lea.hbm %s3108_s4, %s2091_s9  ;;  %s3053_s10 = int_to_ptr.vmem [resolvable:$true] %s1775_s10 }
  0x44   : > { %2324 = vmatpush3.bf16.msra.mxu0 %v2496_v0  ;;  %2411 = vmatpush3.bf16.msra.mxu1 %v2496_v0  ;;  %v2504_v4 = vld [vmem:[%s2834_s6] sm:$0xff]   ;;  %v2501_v7 = vld [vmem:[#allocation6 + $0x10] sm:$0xff]   ;;  %v2502_v8 = vld [vmem:[#allocation6 + $0x8] sm:$0xff]   ;;  %s1761_s11 = scalar_lea.sflag [#allocation5], %s2828_s21  ;;  %s2590_s29 = scalar_lea.vmem %s3053_s10, 4096 }
  0x45   : > { %2325 = vmatprep.subr.bf16.mxu0 %v2497_v1  ;;  %2404 = vmatprep.subr.bf16.mxu1 %v2497_v1  ;;  %v2505_v5 = vld [vmem:[%s2834_s6 + $0x80] sm:$0xff]   ;;  %v2506_v10 = vld [vmem:[%s2834_s6 + $0x8] sm:$0xff]   ;;  %v2508_v12 = vld [vmem:[%s2834_s6 + $0x10] sm:$0xff]   ;;  %p2591_p1 = scmp.ne.s32.totalorder %s3053_s10, %s2590_s29  ;;  %p3125_p4 = scmp.ne.s32.totalorder %s3121_s13, 0 }
  0x46   : > { %2339 = vmatprep.mubr.bf16.mxu0 %v2504_v4  ;;  %2371 = vmatprep.mubr.bf16.mxu1 %v2505_v5  ;;  %v2503_v9 = vld [vmem:[#allocation6] sm:$0xff]   ;;  %v2507_v11 = vld [vmem:[%s2834_s6 + $0x88] sm:$0xff]   ;;  %v2509_v13 = vld [vmem:[%s2834_s6 + $0x90] sm:$0xff]   ;;  %s2680_s12 = smov [#allocation8]  }
  0x47   : > { %v2510_v14 = vld [vmem:[%s2834_s6 + $0x18] sm:$0xff]   ;;  %v2512_v16 = vld [vmem:[%s2834_s6 + $0x20] sm:$0xff]   ;;  %v2514_v18 = vld [vmem:[%s2834_s6 + $0x28] sm:$0xff]   ;;  %p2592_p8 = pnand %p2591_p1, %p3125_p4  ;;  %s2594_s22 = sshll.u32 %s2680_s12, 4  ;;  %s2595_s22 = int_to_ptr.vmem [resolvable:$false] %s2594_s22 }
  0x48   : > { %2326 = vmatpush3.bf16.msra.mxu0 %v2497_v1  ;;  %2412 = vmatpush3.bf16.msra.mxu1 %v2497_v1  ;;  %v2511_v15 = vld [vmem:[%s2834_s6 + $0x98] sm:$0xff]   ;;  %v2513_v17 = vld [vmem:[%s2834_s6 + $0xa0] sm:$0xff]   ;;  %v2515_v19 = vld [vmem:[%s2834_s6 + $0xa8] sm:$0xff]   ;;  %s2596_s1 = scalar_lea.vmem %s2595_s22, 8192  ;;  %p2597_p13 = scmp.lt.s32.totalorder %s3053_s10, %s2595_s22 }
  0x49   : > { %2327 = vmatprep.subr.bf16.mxu0 %v2498_v2  ;;  %2405 = vmatprep.subr.bf16.mxu1 %v2498_v2  ;;  %v2516_v20 = vld [vmem:[%s2834_s6 + $0x30] sm:$0xff]   ;;  %v2518_v22 = vld [vmem:[%s2834_s6 + $0x38] sm:$0xff]   ;;  %v2520_v24 = vld [vmem:[%s2834_s6 + $0x40] sm:$0xff]   ;;  %p2593_p12 = pneg %p2592_p8  ;;  %p2598_p0 = scmp.lt.s32.totalorder %s2596_s1, %s2590_s29 }
  0x4a   : > { %v2517_v21 = vld [vmem:[%s2834_s6 + $0xb0] sm:$0xff]   ;;  %v2519_v23 = vld [vmem:[%s2834_s6 + $0xb8] sm:$0xff]   ;;  %v2521_v25 = vld [vmem:[%s2834_s6 + $0xc0] sm:$0xff]  }
  0x4b   : > { %v2522_v26 = vld [vmem:[%s2834_s6 + $0x48] sm:$0xff]   ;;  %v2524_v28 = vld [vmem:[%s2834_s6 + $0x50] sm:$0xff]   ;;  %v2526_v30 = vld [vmem:[%s2834_s6 + $0x58] sm:$0xff]   ;;  %p2599_p2 = por %p2598_p0, %p2597_p13 }
  0x4c   : > { %2328 = vmatpush3.bf16.msra.mxu0 %v2498_v2  ;;  %2413 = vmatpush3.bf16.msra.mxu1 %v2498_v2  ;;  %v2523_v27 = vld [vmem:[%s2834_s6 + $0xc8] sm:$0xff]   ;;  %v2525_v29 = vld [vmem:[%s2834_s6 + $0xd0] sm:$0xff]   ;;  %v2527_v31 = vld [vmem:[%s2834_s6 + $0xd8] sm:$0xff]  }
  0x4d   : > { %2329 = vmatprep.subr.bf16.mxu0 %v2499_v3  ;;  %2406 = vmatprep.subr.bf16.mxu1 %v2499_v3  ;;  %v2528_v32 = vld [vmem:[%s2834_s6 + $0x60] sm:$0xff]   ;;  %v2530_v34 = vld [vmem:[%s2834_s6 + $0x68] sm:$0xff]   ;;  %v2532_v36 = vld [vmem:[%s2834_s6 + $0x70] sm:$0xff]   ;;  %p2600_p3 = pnand %p2599_p2, %p2593_p12 }
  0x4e   : > { %v2529_v33 = vld [vmem:[%s2834_s6 + $0xe0] sm:$0xff]   ;;  %v2531_v35 = vld [vmem:[%s2834_s6 + $0xe8] sm:$0xff]   ;;  %v2533_v37 = vld [vmem:[%s2834_s6 + $0xf0] sm:$0xff]  }
  0x4f   : > { %v2534_v38 = vld [vmem:[%s2834_s6 + $0x78] sm:$0xff]   ;;  %v2879_v40 = vld [vmem:[%s3106_s2] ss:$0 sm:$0xff] }
  0x50   : > { %2330 = vmatpush3.bf16.msra.mxu0 %v2499_v3  ;;  %2414 = vmatpush3.bf16.msra.mxu1 %v2499_v3  ;;  %v2535_v39 = vld [vmem:[%s2834_s6 + $0xf8] sm:$0xff]   ;;  %v2886_v45 = vld [vmem:[%s3107_s3] ss:$0 sm:$0xff] }
  0x51   : > { %2331 = vmatprep.subr.bf16.mxu0 %v2500_v6  ;;  %2407 = vmatprep.subr.bf16.mxu1 %v2500_v6 }
  0x54   : > { %2332 = vmatpush3.bf16.msra.mxu0 %v2500_v6  ;;  %2415 = vmatpush3.bf16.msra.mxu1 %v2500_v6 }
  0x55   : > { %2333 = vmatprep.subr.bf16.mxu0 %v2501_v7  ;;  %2408 = vmatprep.subr.bf16.mxu1 %v2501_v7 }
  0x58   : > { %2334 = vmatpush3.bf16.msra.mxu0 %v2501_v7  ;;  %2416 = vmatpush3.bf16.msra.mxu1 %v2501_v7 }
  0x59   : > { %2335 = vmatprep.subr.bf16.mxu0 %v2502_v8  ;;  %2409 = vmatprep.subr.bf16.mxu1 %v2502_v8 }
  0x5c   : > { %2336 = vmatpush3.bf16.msra.mxu0 %v2502_v8  ;;  %2417 = vmatpush3.bf16.msra.mxu1 %v2502_v8 }
  0x5d   : > { %2337 = vmatprep.subr.bf16.mxu0 %v2503_v9  ;;  %2410 = vmatprep.subr.bf16.mxu1 %v2503_v9 }
  0x60   : > { %2338 = vmatpush3.bf16.msra.mxu0 %v2503_v9  ;;  %2418 = vmatpush3.bf16.msra.mxu1 %v2503_v9 }
  0x63   : > { %2340 = vmatmul.mubr.bf16.vlgmr.msra.gmra.mxu0 %v2506_v10  ;;  %2372 = vmatmul.mubr.bf16.vlgmr.msra.gmra.mxu1 %v2507_v11 }
  0x64   : > { %2343 = vmatprep.mubr.bf16.mxu0 %v2508_v12  ;;  %2375 = vmatprep.mubr.bf16.mxu1 %v2509_v13 }
  0x6b   : > { %2344 = vmatmul.mubr.bf16.gmra.mxu0 %v2510_v14  ;;  %2376 = vmatmul.mubr.bf16.gmra.mxu1 %v2511_v15 }
  0x6c   : > { %2347 = vmatprep.mubr.bf16.mxu0 %v2512_v16  ;;  %2379 = vmatprep.mubr.bf16.mxu1 %v2513_v17 }
  0x73   : > { %2348 = vmatmul.mubr.bf16.gmra.mxu0 %v2514_v18  ;;  %2380 = vmatmul.mubr.bf16.gmra.mxu1 %v2515_v19 }
  0x74   : > { %2351 = vmatprep.mubr.bf16.mxu0 %v2516_v20  ;;  %2383 = vmatprep.mubr.bf16.mxu1 %v2517_v21 }
  0x7b   : > { %2352 = vmatmul.mubr.bf16.gmra.mxu0 %v2518_v22  ;;  %2384 = vmatmul.mubr.bf16.gmra.mxu1 %v2519_v23 }
  0x7c   : > { %2355 = vmatprep.mubr.bf16.mxu0 %v2520_v24  ;;  %2387 = vmatprep.mubr.bf16.mxu1 %v2521_v25 }
  0x83   : > { %2356 = vmatmul.mubr.bf16.gmra.mxu0 %v2522_v26  ;;  %2388 = vmatmul.mubr.bf16.gmra.mxu1 %v2523_v27 }
  0x84   : > { %2359 = vmatprep.mubr.bf16.mxu0 %v2524_v28  ;;  %2391 = vmatprep.mubr.bf16.mxu1 %v2525_v29 }
  0x8b   : > { %2360 = vmatmul.mubr.bf16.gmra.mxu0 %v2526_v30  ;;  %2392 = vmatmul.mubr.bf16.gmra.mxu1 %v2527_v31 }
  0x8c   : > { %2363 = vmatprep.mubr.bf16.mxu0 %v2528_v32  ;;  %2395 = vmatprep.mubr.bf16.mxu1 %v2529_v33 }
  0x93   : > { %2364 = vmatmul.mubr.bf16.gmra.mxu0 %v2530_v34  ;;  %2396 = vmatmul.mubr.bf16.gmra.mxu1 %v2531_v35 }
  0x94   : > { %2367 = vmatprep.mubr.bf16.mxu0 %v2532_v36  ;;  %2399 = vmatprep.mubr.bf16.mxu1 %v2533_v37 }
  0x9b   : > { %2368 = vmatmul.mubr.bf16.gmra.mxu0 %v2534_v38  ;;  %2400 = vmatmul.mubr.bf16.gmra.mxu1 %v2535_v39 }
 0x123   : > { %v2341_v41 = vpop.f32.mrf.mxu0  ;;  %v2373_v42 = vpop.f32.mrf.mxu1 }
 0x124   : > { %v1243_v43 = vmul.f32 %v2341_v41, %v2879_v40  ;;  %v1275_v44 = vmul.f32 %v2373_v42, %v2879_v40 }
 0x125   : > { %v784_v46 = vpop.f32.mrf.mxu0  ;;  %v912_v47 = vpop.f32.mrf.mxu1 }
 0x126   : > { %v1241_v48 = vmul.f32 %v2879_v40, %v784_v46  ;;  %v1273_v49 = vmul.f32 %v2879_v40, %v912_v47  ;;  %v1314_v52 = vadd.f32 %v2886_v45, %v1243_v43  ;;  %v1346_v53 = vadd.f32 %v2886_v45, %v1275_v44 }
 0x127   : > { %v2342_v50 = vpop.f32.mrf.mxu0  ;;  %v2374_v51 = vpop.f32.mrf.mxu1 }
 0x128   : > { %v1244_v54 = vmul.f32 %v2342_v50, %v2879_v40  ;;  %v1276_v55 = vmul.f32 %v2374_v51, %v2879_v40  ;;  %v1312_v58 = vadd.f32 %v2886_v45, %v1241_v48  ;;  %v1344_v59 = vadd.f32 %v2886_v45, %v1273_v49 }
 0x129   : > { %v787_v56 = vpop.f32.mrf.mxu0  ;;  %v915_v57 = vpop.f32.mrf.mxu1  ;;  %v1378_v2 = vmax.f32 %v1314_v52, 0.0  ;;  %v1410_v3 = vmax.f32 %v1346_v53, 0.0 }
 0x12a   : > { %v1242_v60 = vmul.f32 %v2879_v40, %v787_v56  ;;  %v1274_v61 = vmul.f32 %v2879_v40, %v915_v57  ;;  %v1315_v62 = vadd.f32 %v2886_v45, %v1244_v54  ;;  %v1347_v63 = vadd.f32 %v2886_v45, %v1276_v55 }
 0x12b   : > { %v2345_v0 = vpop.f32.mrf.mxu0  ;;  %v2377_v1 = vpop.f32.mrf.mxu1  ;;  %v1376_v12 = vmax.f32 %v1312_v58, 0.0  ;;  %v1408_v13 = vmax.f32 %v1344_v59, 0.0 }
 0x12c   : > { %v1313_v4 = vadd.f32 %v2886_v45, %v1242_v60  ;;  %v1345_v5 = vadd.f32 %v2886_v45, %v1274_v61  ;;  %v1379_v6 = vmax.f32 %v1315_v62, 0.0  ;;  %v1411_v7 = vmax.f32 %v1347_v63, 0.0 }
 0x12d   : > { %v1247_v8 = vmul.f32 %v2345_v0, %v2879_v40  ;;  %v1279_v9 = vmul.f32 %v2377_v1, %v2879_v40  ;;  %v800_v10 = vpop.f32.mrf.mxu0  ;;  %v928_v11 = vpop.f32.mrf.mxu1 }
 0x12e   : > { %v1377_v14 = vmax.f32 %v1313_v4, 0.0  ;;  %v1409_v15 = vmax.f32 %v1345_v5, 0.0  ;;  %v2100_v16 = vpack.c.bf16 %v1379_v6, %v1378_v2  ;;  %v2180_v17 = vpack.c.bf16 %v1411_v7, %v1410_v3 }
 0x12f   : > { %v1245_v18 = vmul.f32 %v2879_v40, %v800_v10  ;;  %v1277_v19 = vmul.f32 %v2879_v40, %v928_v11  ;;  %v2346_v20 = vpop.f32.mrf.mxu0  ;;  %v2378_v21 = vpop.f32.mrf.mxu1  ;;  %v1318_v24 = vadd.f32 %v2886_v45, %v1247_v8  ;;  %v1350_v25 = vadd.f32 %v2886_v45, %v1279_v9 }
 0x130   : > { %v2095_v22 = vpack.c.bf16 %v1377_v14, %v1376_v12  ;;  %v2175_v23 = vpack.c.bf16 %v1409_v15, %v1408_v13  ;;  %2252 = vst [vmem:[%s2908_s8 + $0x8] sm:$0xff] %v2100_v16   ;;  %2268 = vst [vmem:[%s2908_s8 + $0x88] sm:$0xff] %v2180_v17   ;;  %v1248_v26 = vmul.f32 %v2346_v20, %v2879_v40 }
 0x131   : > { %v1280_v27 = vmul.f32 %v2378_v21, %v2879_v40  ;;  %v803_v28 = vpop.f32.mrf.mxu0  ;;  %v931_v29 = vpop.f32.mrf.mxu1  ;;  %v1316_v30 = vadd.f32 %v2886_v45, %v1245_v18  ;;  %v1348_v31 = vadd.f32 %v2886_v45, %v1277_v19  ;;  %v1382_v43 = vmax.f32 %v1318_v24, 0.0 }
 0x132   : > { %2096 = vst [vmem:[%s2908_s8] sm:$0xff] %v2095_v22   ;;  %2267 = vst [vmem:[%s2908_s8 + $0x80] sm:$0xff] %v2175_v23   ;;  %v1246_v32 = vmul.f32 %v2879_v40, %v803_v28  ;;  %v1278_v33 = vmul.f32 %v2879_v40, %v931_v29  ;;  %v1319_v34 = vadd.f32 %v2886_v45, %v1248_v26  ;;  %v1414_v44 = vmax.f32 %v1350_v25, 0.0 }
 0x133   : > { %v1351_v35 = vadd.f32 %v2886_v45, %v1280_v27  ;;  %v2349_v36 = vpop.f32.mrf.mxu0  ;;  %v2381_v37 = vpop.f32.mrf.mxu1  ;;  %v1380_v50 = vmax.f32 %v1316_v30, 0.0  ;;  %v1412_v51 = vmax.f32 %v1348_v31, 0.0 }
 0x134   : > { %v1317_v38 = vadd.f32 %v2886_v45, %v1246_v32  ;;  %v1349_v39 = vadd.f32 %v2886_v45, %v1278_v33  ;;  %v1251_v41 = vmul.f32 %v2349_v36, %v2879_v40  ;;  %v1283_v42 = vmul.f32 %v2381_v37, %v2879_v40 }
 0x135   : > { %v1383_v46 = vmax.f32 %v1319_v34, 0.0  ;;  %v1415_v47 = vmax.f32 %v1351_v35, 0.0  ;;  %v816_v48 = vpop.f32.mrf.mxu0  ;;  %v944_v49 = vpop.f32.mrf.mxu1 }
 0x136   : > { %v1381_v52 = vmax.f32 %v1317_v38, 0.0  ;;  %v1413_v53 = vmax.f32 %v1349_v39, 0.0  ;;  %v1249_v56 = vmul.f32 %v2879_v40, %v816_v48  ;;  %v1281_v57 = vmul.f32 %v2879_v40, %v944_v49 }
 0x137   : > { %v2110_v54 = vpack.c.bf16 %v1383_v46, %v1382_v43  ;;  %v2190_v55 = vpack.c.bf16 %v1415_v47, %v1414_v44  ;;  %v2350_v58 = vpop.f32.mrf.mxu0  ;;  %v2382_v59 = vpop.f32.mrf.mxu1  ;;  %v1322_v62 = vadd.f32 %v2886_v45, %v1251_v41  ;;  %v1354_v63 = vadd.f32 %v2886_v45, %v1283_v42 }
 0x138   : > { %v2105_v60 = vpack.c.bf16 %v1381_v52, %v1380_v50  ;;  %v2185_v61 = vpack.c.bf16 %v1413_v53, %v1412_v51  ;;  %v1252_v0 = vmul.f32 %v2350_v58, %v2879_v40  ;;  %v1284_v1 = vmul.f32 %v2382_v59, %v2879_v40 }
 0x139   : > { %2254 = vst [vmem:[%s2908_s8 + $0x18] sm:$0xff] %v2110_v54   ;;  %2270 = vst [vmem:[%s2908_s8 + $0x98] sm:$0xff] %v2190_v55   ;;  %v819_v2 = vpop.f32.mrf.mxu0  ;;  %v947_v3 = vpop.f32.mrf.mxu1  ;;  %v1320_v4 = vadd.f32 %v2886_v45, %v1249_v56  ;;  %v1352_v5 = vadd.f32 %v2886_v45, %v1281_v57  ;;  %v1386_v12 = vmax.f32 %v1322_v62, 0.0  ;;  %v1418_v13 = vmax.f32 %v1354_v63, 0.0 }
 0x13a   : > { %2253 = vst [vmem:[%s2908_s8 + $0x10] sm:$0xff] %v2105_v60   ;;  %2269 = vst [vmem:[%s2908_s8 + $0x90] sm:$0xff] %v2185_v61   ;;  %v1250_v6 = vmul.f32 %v2879_v40, %v819_v2  ;;  %v1282_v7 = vmul.f32 %v2879_v40, %v947_v3  ;;  %v1323_v8 = vadd.f32 %v2886_v45, %v1252_v0 }
 0x13b   : > { %v1355_v9 = vadd.f32 %v2886_v45, %v1284_v1  ;;  %v2353_v10 = vpop.f32.mrf.mxu0  ;;  %v2385_v11 = vpop.f32.mrf.mxu1  ;;  %v1384_v22 = vmax.f32 %v1320_v4, 0.0  ;;  %v1416_v23 = vmax.f32 %v1352_v5, 0.0 }
 0x13c   : > { %v1321_v14 = vadd.f32 %v2886_v45, %v1250_v6  ;;  %v1353_v15 = vadd.f32 %v2886_v45, %v1282_v7  ;;  %v1387_v16 = vmax.f32 %v1323_v8, 0.0  ;;  %v1255_v18 = vmul.f32 %v2353_v10, %v2879_v40 }
 0x13d   : > { %v1419_v17 = vmax.f32 %v1355_v9, 0.0  ;;  %v1287_v19 = vmul.f32 %v2385_v11, %v2879_v40  ;;  %v832_v20 = vpop.f32.mrf.mxu0  ;;  %v960_v21 = vpop.f32.mrf.mxu1 }
 0x13e   : > { %v1385_v24 = vmax.f32 %v1321_v14, 0.0  ;;  %v1417_v25 = vmax.f32 %v1353_v15, 0.0  ;;  %v2120_v26 = vpack.c.bf16 %v1387_v16, %v1386_v12  ;;  %v1253_v28 = vmul.f32 %v2879_v40, %v832_v20 }
 0x13f   : > { %v2200_v27 = vpack.c.bf16 %v1419_v17, %v1418_v13  ;;  %v1285_v29 = vmul.f32 %v2879_v40, %v960_v21  ;;  %v2354_v30 = vpop.f32.mrf.mxu0  ;;  %v2386_v31 = vpop.f32.mrf.mxu1  ;;  %v1326_v34 = vadd.f32 %v2886_v45, %v1255_v18  ;;  %v1358_v35 = vadd.f32 %v2886_v45, %v1287_v19 }
 0x140   : > { %v2115_v32 = vpack.c.bf16 %v1385_v24, %v1384_v22  ;;  %v2195_v33 = vpack.c.bf16 %v1417_v25, %v1416_v23  ;;  %2256 = vst [vmem:[%s2908_s8 + $0x28] sm:$0xff] %v2120_v26   ;;  %v1256_v36 = vmul.f32 %v2354_v30, %v2879_v40  ;;  %v1288_v37 = vmul.f32 %v2386_v31, %v2879_v40 }
 0x141   : > { %2272 = vst [vmem:[%s2908_s8 + $0xa8] sm:$0xff] %v2200_v27   ;;  %v835_v38 = vpop.f32.mrf.mxu0  ;;  %v963_v39 = vpop.f32.mrf.mxu1  ;;  %v1324_v41 = vadd.f32 %v2886_v45, %v1253_v28  ;;  %v1356_v42 = vadd.f32 %v2886_v45, %v1285_v29  ;;  %v1390_v54 = vmax.f32 %v1326_v34, 0.0  ;;  %v1422_v55 = vmax.f32 %v1358_v35, 0.0 }
 0x142   : > { %2255 = vst [vmem:[%s2908_s8 + $0x20] sm:$0xff] %v2115_v32   ;;  %2271 = vst [vmem:[%s2908_s8 + $0xa0] sm:$0xff] %v2195_v33   ;;  %v1254_v43 = vmul.f32 %v2879_v40, %v835_v38  ;;  %v1286_v44 = vmul.f32 %v2879_v40, %v963_v39  ;;  %v1327_v46 = vadd.f32 %v2886_v45, %v1256_v36 }
 0x143   : > { %v1359_v47 = vadd.f32 %v2886_v45, %v1288_v37  ;;  %v2357_v48 = vpop.f32.mrf.mxu0  ;;  %v2389_v49 = vpop.f32.mrf.mxu1  ;;  %v1388_v60 = vmax.f32 %v1324_v41, 0.0  ;;  %v1420_v61 = vmax.f32 %v1356_v42, 0.0 }
 0x144   : > { %v1325_v50 = vadd.f32 %v2886_v45, %v1254_v43  ;;  %v1357_v51 = vadd.f32 %v2886_v45, %v1286_v44  ;;  %v1259_v52 = vmul.f32 %v2357_v48, %v2879_v40  ;;  %v1291_v53 = vmul.f32 %v2389_v49, %v2879_v40 }
 0x145   : > { %v1391_v56 = vmax.f32 %v1327_v46, 0.0  ;;  %v1423_v57 = vmax.f32 %v1359_v47, 0.0  ;;  %v848_v58 = vpop.f32.mrf.mxu0  ;;  %v976_v59 = vpop.f32.mrf.mxu1 }
 0x146   : > { %v1389_v62 = vmax.f32 %v1325_v50, 0.0  ;;  %v1421_v63 = vmax.f32 %v1357_v51, 0.0  ;;  %v1257_v2 = vmul.f32 %v2879_v40, %v848_v58  ;;  %v1289_v3 = vmul.f32 %v2879_v40, %v976_v59 }
 0x147   : > { %v2130_v0 = vpack.c.bf16 %v1391_v56, %v1390_v54  ;;  %v2210_v1 = vpack.c.bf16 %v1423_v57, %v1422_v55  ;;  %v2358_v4 = vpop.f32.mrf.mxu0  ;;  %v2390_v5 = vpop.f32.mrf.mxu1  ;;  %v1330_v8 = vadd.f32 %v2886_v45, %v1259_v52  ;;  %v1362_v9 = vadd.f32 %v2886_v45, %v1291_v53 }
 0x148   : > { %v2125_v6 = vpack.c.bf16 %v1389_v62, %v1388_v60  ;;  %v2205_v7 = vpack.c.bf16 %v1421_v63, %v1420_v61  ;;  %v1260_v10 = vmul.f32 %v2358_v4, %v2879_v40  ;;  %v1292_v11 = vmul.f32 %v2390_v5, %v2879_v40 }
 0x149   : > { %2258 = vst [vmem:[%s2908_s8 + $0x38] sm:$0xff] %v2130_v0   ;;  %2274 = vst [vmem:[%s2908_s8 + $0xb8] sm:$0xff] %v2210_v1   ;;  %v851_v12 = vpop.f32.mrf.mxu0  ;;  %v979_v13 = vpop.f32.mrf.mxu1  ;;  %v1328_v14 = vadd.f32 %v2886_v45, %v1257_v2  ;;  %v1360_v15 = vadd.f32 %v2886_v45, %v1289_v3  ;;  %v1394_v22 = vmax.f32 %v1330_v8, 0.0  ;;  %v1426_v23 = vmax.f32 %v1362_v9, 0.0 }
 0x14a   : > { %2257 = vst [vmem:[%s2908_s8 + $0x30] sm:$0xff] %v2125_v6   ;;  %2273 = vst [vmem:[%s2908_s8 + $0xb0] sm:$0xff] %v2205_v7   ;;  %v1258_v16 = vmul.f32 %v2879_v40, %v851_v12  ;;  %v1290_v17 = vmul.f32 %v2879_v40, %v979_v13  ;;  %v1331_v18 = vadd.f32 %v2886_v45, %v1260_v10 }
 0x14b   : > { %v1363_v19 = vadd.f32 %v2886_v45, %v1292_v11  ;;  %v2361_v20 = vpop.f32.mrf.mxu0  ;;  %v2393_v21 = vpop.f32.mrf.mxu1  ;;  %v1392_v32 = vmax.f32 %v1328_v14, 0.0  ;;  %v1424_v33 = vmax.f32 %v1360_v15, 0.0 }
 0x14c   : > { %v1329_v24 = vadd.f32 %v2886_v45, %v1258_v16  ;;  %v1361_v25 = vadd.f32 %v2886_v45, %v1290_v17  ;;  %v1395_v26 = vmax.f32 %v1331_v18, 0.0  ;;  %v1263_v28 = vmul.f32 %v2361_v20, %v2879_v40 }
 0x14d   : > { %v1427_v27 = vmax.f32 %v1363_v19, 0.0  ;;  %v1295_v29 = vmul.f32 %v2393_v21, %v2879_v40  ;;  %v864_v30 = vpop.f32.mrf.mxu0  ;;  %v992_v31 = vpop.f32.mrf.mxu1 }
 0x14e   : > { %v1393_v34 = vmax.f32 %v1329_v24, 0.0  ;;  %v1425_v35 = vmax.f32 %v1361_v25, 0.0  ;;  %v2140_v36 = vpack.c.bf16 %v1395_v26, %v1394_v22  ;;  %v1261_v38 = vmul.f32 %v2879_v40, %v864_v30 }
 0x14f   : > { %v2220_v37 = vpack.c.bf16 %v1427_v27, %v1426_v23  ;;  %v1293_v39 = vmul.f32 %v2879_v40, %v992_v31  ;;  %v2362_v41 = vpop.f32.mrf.mxu0  ;;  %v2394_v42 = vpop.f32.mrf.mxu1  ;;  %v1334_v46 = vadd.f32 %v2886_v45, %v1263_v28  ;;  %v1366_v47 = vadd.f32 %v2886_v45, %v1295_v29 }
 0x150   : > { %v2135_v43 = vpack.c.bf16 %v1393_v34, %v1392_v32  ;;  %v2215_v44 = vpack.c.bf16 %v1425_v35, %v1424_v33  ;;  %2260 = vst [vmem:[%s2908_s8 + $0x48] sm:$0xff] %v2140_v36   ;;  %v1264_v48 = vmul.f32 %v2362_v41, %v2879_v40  ;;  %v1296_v49 = vmul.f32 %v2394_v42, %v2879_v40 }
 0x151   : > { %2276 = vst [vmem:[%s2908_s8 + $0xc8] sm:$0xff] %v2220_v37   ;;  %v867_v50 = vpop.f32.mrf.mxu0  ;;  %v995_v51 = vpop.f32.mrf.mxu1  ;;  %v1332_v52 = vadd.f32 %v2886_v45, %v1261_v38  ;;  %v1364_v53 = vadd.f32 %v2886_v45, %v1293_v39  ;;  %v1398_v0 = vmax.f32 %v1334_v46, 0.0  ;;  %v1430_v1 = vmax.f32 %v1366_v47, 0.0 }
 0x152   : > { %2259 = vst [vmem:[%s2908_s8 + $0x40] sm:$0xff] %v2135_v43   ;;  %2275 = vst [vmem:[%s2908_s8 + $0xc0] sm:$0xff] %v2215_v44   ;;  %v1262_v54 = vmul.f32 %v2879_v40, %v867_v50  ;;  %v1294_v55 = vmul.f32 %v2879_v40, %v995_v51  ;;  %v1335_v56 = vadd.f32 %v2886_v45, %v1264_v48 }
 0x153   : > { %v1367_v57 = vadd.f32 %v2886_v45, %v1296_v49  ;;  %v2365_v58 = vpop.f32.mrf.mxu0  ;;  %v2397_v59 = vpop.f32.mrf.mxu1  ;;  %v1396_v6 = vmax.f32 %v1332_v52, 0.0  ;;  %v1428_v7 = vmax.f32 %v1364_v53, 0.0 }
 0x154   : > { %v1333_v60 = vadd.f32 %v2886_v45, %v1262_v54  ;;  %v1365_v61 = vadd.f32 %v2886_v45, %v1294_v55  ;;  %v1267_v62 = vmul.f32 %v2365_v58, %v2879_v40  ;;  %v1299_v63 = vmul.f32 %v2397_v59, %v2879_v40 }
 0x155   : > { %v1399_v2 = vmax.f32 %v1335_v56, 0.0  ;;  %v1431_v3 = vmax.f32 %v1367_v57, 0.0  ;;  %v880_v4 = vpop.f32.mrf.mxu0  ;;  %v1008_v5 = vpop.f32.mrf.mxu1 }
 0x156   : > { %v1397_v8 = vmax.f32 %v1333_v60, 0.0  ;;  %v1429_v9 = vmax.f32 %v1365_v61, 0.0  ;;  %v1265_v12 = vmul.f32 %v2879_v40, %v880_v4  ;;  %v1297_v13 = vmul.f32 %v2879_v40, %v1008_v5 }
 0x157   : > { %v2150_v10 = vpack.c.bf16 %v1399_v2, %v1398_v0  ;;  %v2230_v11 = vpack.c.bf16 %v1431_v3, %v1430_v1  ;;  %v2366_v14 = vpop.f32.mrf.mxu0  ;;  %v2398_v15 = vpop.f32.mrf.mxu1  ;;  %v1338_v18 = vadd.f32 %v2886_v45, %v1267_v62  ;;  %v1370_v19 = vadd.f32 %v2886_v45, %v1299_v63 }
 0x158   : > { %v2145_v16 = vpack.c.bf16 %v1397_v8, %v1396_v6  ;;  %v2225_v17 = vpack.c.bf16 %v1429_v9, %v1428_v7  ;;  %v1268_v20 = vmul.f32 %v2366_v14, %v2879_v40  ;;  %v1300_v21 = vmul.f32 %v2398_v15, %v2879_v40 }
 0x159   : > { %2262 = vst [vmem:[%s2908_s8 + $0x58] sm:$0xff] %v2150_v10   ;;  %2278 = vst [vmem:[%s2908_s8 + $0xd8] sm:$0xff] %v2230_v11   ;;  %v883_v22 = vpop.f32.mrf.mxu0  ;;  %v1011_v23 = vpop.f32.mrf.mxu1  ;;  %v1336_v24 = vadd.f32 %v2886_v45, %v1265_v12  ;;  %v1368_v25 = vadd.f32 %v2886_v45, %v1297_v13  ;;  %v1402_v32 = vmax.f32 %v1338_v18, 0.0  ;;  %v1434_v33 = vmax.f32 %v1370_v19, 0.0 }
 0x15a   : > { %2261 = vst [vmem:[%s2908_s8 + $0x50] sm:$0xff] %v2145_v16   ;;  %2277 = vst [vmem:[%s2908_s8 + $0xd0] sm:$0xff] %v2225_v17   ;;  %v1266_v26 = vmul.f32 %v2879_v40, %v883_v22  ;;  %v1298_v27 = vmul.f32 %v2879_v40, %v1011_v23  ;;  %v1339_v28 = vadd.f32 %v2886_v45, %v1268_v20 }
 0x15b   : > { %v1371_v29 = vadd.f32 %v2886_v45, %v1300_v21  ;;  %v2369_v30 = vpop.f32.mrf.mxu0  ;;  %v2401_v31 = vpop.f32.mrf.mxu1  ;;  %v1400_v43 = vmax.f32 %v1336_v24, 0.0  ;;  %v1432_v44 = vmax.f32 %v1368_v25, 0.0 }
 0x15c   : > { %v1337_v34 = vadd.f32 %v2886_v45, %v1266_v26  ;;  %v1369_v35 = vadd.f32 %v2886_v45, %v1298_v27  ;;  %v1403_v36 = vmax.f32 %v1339_v28, 0.0  ;;  %v1271_v38 = vmul.f32 %v2369_v30, %v2879_v40 }
 0x15d   : > { %v1435_v37 = vmax.f32 %v1371_v29, 0.0  ;;  %v1303_v39 = vmul.f32 %v2401_v31, %v2879_v40  ;;  %v896_v41 = vpop.f32.mrf.mxu0  ;;  %v1024_v42 = vpop.f32.mrf.mxu1 }
 0x15e   : > { %v1401_v46 = vmax.f32 %v1337_v34, 0.0  ;;  %v1433_v47 = vmax.f32 %v1369_v35, 0.0  ;;  %v2160_v48 = vpack.c.bf16 %v1403_v36, %v1402_v32  ;;  %v1269_v50 = vmul.f32 %v2879_v40, %v896_v41 }
 0x15f   : > { %v2240_v49 = vpack.c.bf16 %v1435_v37, %v1434_v33  ;;  %v1301_v51 = vmul.f32 %v2879_v40, %v1024_v42  ;;  %v2370_v52 = vpop.f32.mrf.mxu0  ;;  %v2402_v53 = vpop.f32.mrf.mxu1  ;;  %v1342_v56 = vadd.f32 %v2886_v45, %v1271_v38  ;;  %v1374_v57 = vadd.f32 %v2886_v45, %v1303_v39 }
 0x160   : > { %v2155_v54 = vpack.c.bf16 %v1401_v46, %v1400_v43  ;;  %v2235_v55 = vpack.c.bf16 %v1433_v47, %v1432_v44  ;;  %2264 = vst [vmem:[%s2908_s8 + $0x68] sm:$0xff] %v2160_v48   ;;  %v1272_v58 = vmul.f32 %v2370_v52, %v2879_v40  ;;  %v1304_v59 = vmul.f32 %v2402_v53, %v2879_v40 }
 0x161   : > { %2280 = vst [vmem:[%s2908_s8 + $0xe8] sm:$0xff] %v2240_v49   ;;  %v899_v60 = vpop.f32.mrf.mxu0  ;;  %v1027_v61 = vpop.f32.mrf.mxu1  ;;  %v1340_v62 = vadd.f32 %v2886_v45, %v1269_v50  ;;  %v1372_v63 = vadd.f32 %v2886_v45, %v1301_v51  ;;  %v1406_v6 = vmax.f32 %v1342_v56, 0.0  ;;  %v1438_v7 = vmax.f32 %v1374_v57, 0.0 }
 0x162   : > { %2263 = vst [vmem:[%s2908_s8 + $0x60] sm:$0xff] %v2155_v54   ;;  %2279 = vst [vmem:[%s2908_s8 + $0xe0] sm:$0xff] %v2235_v55   ;;  %v1270_v0 = vmul.f32 %v2879_v40, %v899_v60  ;;  %v1302_v1 = vmul.f32 %v2879_v40, %v1027_v61  ;;  %v1343_v2 = vadd.f32 %v2886_v45, %v1272_v58 }
 0x163   : > { %v1375_v3 = vadd.f32 %v2886_v45, %v1304_v59  ;;  %v1404_v40 = vmax.f32 %v1340_v62, 0.0  ;;  %v1436_v10 = vmax.f32 %v1372_v63, 0.0 }
 0x164   : > { %v1341_v4 = vadd.f32 %v2886_v45, %v1270_v0  ;;  %v1373_v5 = vadd.f32 %v2886_v45, %v1302_v1  ;;  %v1407_v8 = vmax.f32 %v1343_v2, 0.0 }
 0x165   : > { %v1439_v9 = vmax.f32 %v1375_v3, 0.0 }
 0x166   : > { %v1405_v11 = vmax.f32 %v1341_v4, 0.0  ;;  %v1437_v12 = vmax.f32 %v1373_v5, 0.0  ;;  %v2170_v13 = vpack.c.bf16 %v1407_v8, %v1406_v6 }
 0x167   : > { %v2250_v14 = vpack.c.bf16 %v1439_v9, %v1438_v7 }
 0x168   : > { %v2165_v45 = vpack.c.bf16 %v1405_v11, %v1404_v40  ;;  %v2245_v15 = vpack.c.bf16 %v1437_v12, %v1436_v10  ;;  %2266 = vst [vmem:[%s2908_s8 + $0x78] sm:$0xff] %v2170_v13  }
 0x169   : > { %2282 = vst [vmem:[%s2908_s8 + $0xf8] sm:$0xff] %v2250_v14  }
 0x16a   : > { %2265 = vst [vmem:[%s2908_s8 + $0x70] sm:$0xff] %v2165_v45   ;;  %2281 = vst [vmem:[%s2908_s8 + $0xf0] sm:$0xff] %v2245_v15  }
 0x16b   : > { %2603 = shalt.err (!%p2600_p3)
}
 0x16c   : > { %s2604_s30 = scalar_lea.hbm %s3051_s18, 4096  ;;  %s2608_s25 = scalar_lea.hbm %s3108_s4, 16384 }
 0x16d   : > { %p2605_p5 = scmp.ne.s32.totalorder %s3051_s18, %s2604_s30  ;;  %p2609_p9 = scmp.lt.s32.totalorder %s3051_s18, %s3108_s4 }
 0x16e   : > { %p2610_p11 = scmp.lt.s32.totalorder %s2608_s25, %s2604_s30 }
 0x16f   : > { %p2606_p7 = pnand %p2605_p5, %p3125_p4 }
 0x170   : > { %p2611_p10 = por %p2610_p11, %p2609_p9 }
 0x171   : > { %p2607_p6 = pneg %p2606_p7 }
 0x173   : > { %p2612_p1 = pnand %p2611_p10, %p2607_p6 }
 0x175   : > { %2615 = shalt.err (!%p2612_p1)
}
 0x176   : > { %s2681_s8 = smov 64   ;;  %s2682_s9 = smov 4  }
 0x177   : > { %2425 = dma.vmem_to_hbm [thread:$0]  (%p3125_p4), %s3053_s10, 4096, %s3051_s18, %s1761_s11, %s2681_s8, %s2681_s8, %s2682_s9  }
 0x178 PF: > { %p2442_p8 = scmp.ge.s32.totalorder %s2674_s20, 2  ;;  %s1790_s24 = sand.u32 1, %s2654_s15  }
 0x179   : > { %p3126_p12 = scmp.ne.s32.totalorder %s3116_s26, 0  ;;  %s1791_s14 = scalar_lea.sflag [#allocation5], %s1790_s24 }
 0x17b   : > { %p2436_p13 = pnand %p2442_p8, %p3126_p12 }
 0x17d   : > { %p2437_p0 = pneg %p2436_p13 }
 0x17f   : > { %2649 = dma.done.wait (%p2437_p0), %s1791_s14, 4096  }
 0x180   : > { %2651 = vsyncadd (%p2437_p0), %s1791_s14, 4294963200  ;;  %s21_s20 = sadd.s32 1, %s2674_s20   ;;  %s3127_s15 = smov %s2658_s16 }
 0x181   : > { %p18_p2 = scmp.ge.s32.totalorder %s21_s20, 6   ;;  %s3128_s16 = smov %s2662_s17 }
 0x182   : > { %s3129_s17 = smov %s2806_s28  ;;  %s3130_s18 = smov %s2670_s19 }
 0x183   : > { %s3131_s19 = smov %s3133_s5  ;;  %20 = sbr.rel (!%p18_p2) target bundleno = 9 (0x9), region = 100 }
 0x188   :  { %1796 = vsyncpa [#allocation4], 1 }
 0x189   :  { %1798 = vsyncpa [#allocation4 + $0x1], 1 }
 0x18a   :  { %1799 = vsyncpa [#allocation7], 1 }
 0x18b   :  { %1800 = vsyncpa [#allocation5], 1 }
 0x18c   :  { %1802 = vsyncpa [#allocation5 + $0x1], 1 }

</bundles_post_ra>
